<compile_context>
chip_gen: v7x
topology: tpu7x:2x2x1
jax: 0.10.0
libtpu: 0.0.40
codegen_flags: <defaults>
</compile_context>

<pallas_src>
import functools

import jax
import jax.numpy as jnp
from jax.experimental import pallas as pl
from jax.experimental.pallas import tpu as pltpu

IN_FEATURES = 2048
NUM_CLASSES = 2
LANE = 128           # pad class dim to a multiple of this (lane-dense stores)
MAX_BLOCK_B = 1024   # batch tile (bf16 features): ~10 MiB VMEM total -> safe everywhere


def _round_up(x, m):
    return ((x + m - 1) // m) * m


def _linear_kernel(x_ref, w_ref, b_ref, o_ref):
    # One MXU matmul per (tb, K) batch tile; bf16 inputs, f32 accumulation.
    # Weight/bias stay resident in VMEM (constant index_map).
    acc = jnp.dot(x_ref[...], w_ref[...], preferred_element_type=jnp.float32)
    o_ref[...] = acc + b_ref[...]


def prepare_params(weight_t, bias):
    """One-time param prep: cast weight to bf16 and zero-pad class dim to 128.

    weight_t: (2048, C) == torch W^T;  bias: (C,) or (1, C).
    Returns (w_padded bf16 (2048, c_pad), b_padded f32 (1, c_pad)).
    """
    K, C = weight_t.shape
    c_pad = _round_up(max(C, LANE), LANE)
    w_p = (
        jnp.zeros((K, c_pad), jnp.bfloat16)
        .at[:, :C]
        .set(weight_t.astype(jnp.bfloat16))
    )
    b_p = (
        jnp.zeros((1, c_pad), jnp.float32)
        .at[:, :C]
        .set(jnp.asarray(bias, jnp.float32).reshape(1, C))
    )
    return w_p, b_p


@functools.partial(jax.jit, static_argnames=("num_classes", "block_b"))
def linear_classifier_forward(features, w_padded, b_padded, *,
                              num_classes=NUM_CLASSES, block_b=MAX_BLOCK_B):
    """features: (B, 2048) -> logits (B, num_classes) f32.

    Computes features @ W^T + b with bf16 inputs and f32 MXU accumulation.
    """
    B, K = features.shape
    Kw, c_pad = w_padded.shape
    assert K == Kw == IN_FEATURES
    assert num_classes <= c_pad

    x = features.astype(jnp.bfloat16)          # halve HBM bytes on the big stream

    tb = min(block_b, _round_up(B, 8))         # tile rows, multiple of 8
    grid = (pl.cdiv(B, tb),)                   # partial last block is masked on write

    out = pl.pallas_call(
        _linear_kernel,
        out_shape=jax.ShapeDtypeStruct((B, c_pad), jnp.float32),
        grid_spec=pltpu.PrefetchScalarGridSpec(
            num_scalar_prefetch=0,
            grid=grid,
            in_specs=[
                pl.BlockSpec((tb, K), lambda i: (i, 0)),       # batch tile (pipelined)
                pl.BlockSpec((K, c_pad), lambda i: (0, 0)),    # weight: resident, bf16
                pl.BlockSpec((1, c_pad), lambda i: (0, 0)),    # bias: resident, f32
            ],
            out_specs=pl.BlockSpec((tb, c_pad), lambda i: (i, 0)),
        ),
        compiler_params=pltpu.CompilerParams(
            # Batch tiles are independent -> shardable across TCs; no-op on v5e/v6e.
            dimension_semantics=("parallel",),
        ),
        cost_estimate=pl.CostEstimate(
            flops=2 * B * K * num_classes,
            transcendentals=0,
            bytes_accessed=(B * K * 2)            # bf16 features
            + (K * c_pad * 2)                     # bf16 weight
            + (c_pad * 4)                         # f32 bias
            + (B * c_pad * 4),                    # f32 output
        ),
    )(x, w_padded, b_padded)

    # Slice away the zero-padded logit columns (fuses under jit).
    return out[:, :num_classes]


def init_params(key, num_classes=NUM_CLASSES, in_features=IN_FEATURES):
    # Deterministic init mimicking nn.Linear: U(-1/sqrt(in), 1/sqrt(in)).
    kw, kb = jax.random.split(key)
    bound = 1.0 / jnp.sqrt(jnp.float32(in_features))
    # torch stores weight as (out, in); keep it transposed (in, out) for the kernel.
    weight_t = jax.random.uniform(
        kw, (in_features, num_classes), jnp.float32, -bound, bound
    )
    bias = jax.random.uniform(kb, (1, num_classes), jnp.float32, -bound, bound)
    return weight_t, bias


if __name__ == "__main__":
    key = jax.random.PRNGKey(0)
    k_x, k_p = jax.random.split(key)

    B = 2  # small demo batch
    features = jax.random.normal(k_x, (B, IN_FEATURES), jnp.float32)
    weight_t, bias = init_params(k_p)

    # One-time param prep (bf16 cast + class-dim padding), then jitted forward.
    w_padded, b_padded = prepare_params(weight_t, bias)
    out = linear_classifier_forward(features, w_padded, b_padded,
                                    num_classes=NUM_CLASSES)
    out = jax.block_until_ready(out)

    assert out.shape == (B, NUM_CLASSES)

    # Reference with the same bf16 input quantization, f32 accumulation.
    x_bf = features.astype(jnp.bfloat16).astype(jnp.float32)
    w_bf = weight_t.astype(jnp.bfloat16).astype(jnp.float32)
    ref_bf16 = x_bf @ w_bf + bias.reshape(1, -1)
    assert jnp.allclose(out, ref_bf16, atol=1e-2, rtol=1e-2)

    # Also sanity-check against the pure-f32 torch-parity reference (looser tol
    # because inputs are bf16-quantized; accumulation stays f32).
    ref_f32 = features @ weight_t + bias.reshape(1, -1)
    assert jnp.allclose(out, ref_f32, atol=5e-2, rtol=5e-2)

    print("KERNEL_OK")
</pallas_src>

<mosaic_0001>
module attributes {stable_mosaic.version = 11 : i64} {
  func.func @_linear_kernel(%arg0: i32, %arg1: memref<8x2048xbf16, #tpu.memory_space<vmem>>, %arg2: memref<2048x128xbf16, #tpu.memory_space<vmem>>, %arg3: memref<1x128xf32, #tpu.memory_space<vmem>>, %arg4: memref<8x128xf32, #tpu.memory_space<vmem>>) attributes {dimension_semantics = [#tpu.dimension_semantics<parallel>], iteration_bounds = array<i64: 1>, scalar_prefetch = 0 : i64, scratch_operands = 0 : i64, tpu.core_type = #tpu.core_type<tc>, window_params = [{transform_indices = @transform_0, window_bounds = array<i64: 8, 2048>}, {pipeline_mode = #tpu.pipeline_mode<synchronous>, transform_indices = @transform_1, window_bounds = array<i64: 2048, 128>}, {pipeline_mode = #tpu.pipeline_mode<synchronous>, transform_indices = @transform_2, window_bounds = array<i64: 1, 128>}, {transform_indices = @transform_3, window_bounds = array<i64: 8, 128>}]} {
    %c0 = arith.constant 0 : index
    %c0_0 = arith.constant 0 : index
    %0 = vector.load %arg1[%c0, %c0_0] : memref<8x2048xbf16, #tpu.memory_space<vmem>>, vector<8x2048xbf16>
    %c0_1 = arith.constant 0 : index
    %c0_2 = arith.constant 0 : index
    %1 = vector.load %arg2[%c0_1, %c0_2] : memref<2048x128xbf16, #tpu.memory_space<vmem>>, vector<2048x128xbf16>
    %cst = arith.constant dense<0.000000e+00> : vector<8x128xf32>
    %2 = tpu.matmul %0, %1, %cst {dimension_numbers = #tpu.dot_dimension_numbers<[1], [0], [0], [1], [0, 0, 1, 1], [], []>} : vector<8x2048xbf16>, vector<2048x128xbf16>, vector<8x128xf32> -> vector<8x128xf32>
    %c0_3 = arith.constant 0 : index
    %c0_4 = arith.constant 0 : index
    %3 = vector.load %arg3[%c0_3, %c0_4] : memref<1x128xf32, #tpu.memory_space<vmem>>, vector<1x128xf32>
    %4 = vector.broadcast %3 : vector<1x128xf32> to vector<8x128xf32>
    %5 = arith.addf %2, %4 : vector<8x128xf32>
    %c0_5 = arith.constant 0 : index
    %c0_6 = arith.constant 0 : index
    %6 = vector.load %arg4[%c0_5, %c0_6] : memref<8x128xf32, #tpu.memory_space<vmem>>, vector<8x128xf32>
    tpu.vector_store %arg4[%c0_5, %c0_6], %5 {strides = array<i32>} : memref<8x128xf32, #tpu.memory_space<vmem>>, vector<8x128xf32>,
    return
  }
  func.func @transform_0(%arg0: i32) -> (i32, i32) {
    %c0_i32 = arith.constant 0 : i32
    %c0_i32_0 = arith.constant 0 : i32
    return %arg0, %c0_i32 : i32, i32
  }
  func.func @transform_1(%arg0: i32) -> (i32, i32) {
    %c0_i32 = arith.constant 0 : i32
    %c0_i32_0 = arith.constant 0 : i32
    %c0_i32_1 = arith.constant 0 : i32
    return %c0_i32, %c0_i32_0 : i32, i32
  }
  func.func @transform_2(%arg0: i32) -> (i32, i32) {
    %c0_i32 = arith.constant 0 : i32
    %c0_i32_0 = arith.constant 0 : i32
    %c0_i32_1 = arith.constant 0 : i32
    return %c0_i32, %c0_i32_0 : i32, i32
  }
  func.func @transform_3(%arg0: i32) -> (i32, i32) {
    %c0_i32 = arith.constant 0 : i32
    %c0_i32_0 = arith.constant 0 : i32
    return %arg0, %c0_i32 : i32, i32
  }
}

</mosaic_0001>

<bundles_post_ra>
// kernel: linear_classifier_forward.1
= control target key start
LH: loop header
LB: loop body
LE: loop exit
PB: predicated region body
PF: predicated region fallthrough
CT: control target
= control target key end

     0   :  { %8 = vsyncpa [#allocation3], 0  ;;  %s2171_s0 = inlined_call_operand.vmem [shape: bf16[2,2048], index: 0, kind: input, shape index: {}]   ;;  %s2172_s1 = inlined_call_operand.hbm [shape: bf16[2048,128], index: 1, kind: input, shape index: {}]   ;;  %s2173_s2 = inlined_call_operand.vmem [shape: f32[1,128], index: 2, kind: input, shape index: {}]   ;;  %s2174_s3 = inlined_call_operand.hbm [shape: f32[2,128], index: 3, kind: output, shape index: {}]  }
   0x1   :  { %9 = vsyncpa [#allocation4], 0  ;;  %s2067_s12 = smov [#allocation2]   ;;  %s2019_s16 = scalar_lea.hbm %s2172_s1, 16384 }
   0x2   :  { %s17_s13 = sshll.u32 %s2067_s12, 4  ;;  %p2020_p0 = scmp.ne.s32.totalorder %s2172_s1, %s2019_s16  ;;  %s18_s13 = int_to_ptr.vmem [resolvable:$true] %s17_s13 }
   0x3   :  { %p2023_p1 = scmp.lt.u32.totalorder %s2019_s16, %s2172_s1 }
   0x5   :  { %p2025_p2 = pnand %p2023_p1, %p2020_p0 }
   0x7   :  { %2028 = shalt.err (!%p2025_p2)
}
   0x8   :  { %s2029_s21 = scalar_lea.vmem %s18_s13, 16384  ;;  %p2034_p4 = scmp.lt.s32.totalorder %s18_s13, %s18_s13 }
   0x9   :  { %p2030_p3 = scmp.ne.s32.totalorder %s18_s13, %s2029_s21  ;;  %p2035_p5 = scmp.lt.s32.totalorder %s2029_s21, %s2029_s21 }
   0xb   :  { %p2036_p6 = por %p2035_p5, %p2034_p4 }
   0xd   :  { %p2037_p7 = pnand %p2036_p6, %p2030_p3 }
   0xf   :  { %2040 = shalt.err (!%p2037_p7)
}
  0x10   :  { %s2068_s22 = smov 64   ;;  %s2069_s23 = smov 4  }
  0x11   :  { %23 = dma.hbm_to_vmem [thread:$0]  %s2172_s1, 16384, %s18_s13, [#allocation3], %s2068_s22, %s2068_s22, %s2069_s23  }
  0x12   :  { %2063 = dma.done.wait [#allocation3], 16384  }
  0x13   :  { %2064 = vsyncadd [#allocation3], 4294950912  ;;  %v1879_v0 = vld [vmem:[#allocation2 + $0x40] sm:$0xff]   ;;  %v1883_v4 = vld [vmem:[#allocation2 + $0x48] sm:$0xff]   ;;  %v2070_v24 = vmov 1966171168   ;;  %v316_v26 = vlaneseq }
  0x14   :  { %v1880_v1 = vld [vmem:[#allocation2 + $0xc0] sm:$0xff]   ;;  %1696 = vmatprep.subr.bf16.mxu0 %v1879_v0  ;;  %v1884_v5 = vld [vmem:[#allocation2 + $0xc8] sm:$0xff]   ;;  %v1887_v8 = vld [vmem:[#allocation2 + $0x50] sm:$0xff]   ;;  %v314_v25 = vunpack.c.l.s4 %v2070_v24 }
  0x15   :  { %v1881_v2 = vld [vmem:[#allocation2] sm:$0xff]   ;;  %1718 = vmatprep.subr.bf16.mxu1 %v1880_v1  ;;  %v1885_v6 = vld [vmem:[#allocation2 + $0x8] sm:$0xff]   ;;  %v1888_v9 = vld [vmem:[#allocation2 + $0xd0] sm:$0xff]   ;;  %v317_v32 = vshrl.u32 %v316_v26, 7 }
  0x16   :  { %v1882_v3 = vld [vmem:[#allocation2 + $0x80] sm:$0xff]   ;;  %1697 = vmatpush3.bf16.msra.mxu0 %v1881_v2  ;;  %v1886_v7 = vld [vmem:[#allocation2 + $0x88] sm:$0xff]   ;;  %v1889_v10 = vld [vmem:[#allocation2 + $0x10] sm:$0xff]   ;;  %v315_v31 = vunpack.c.0.s8 %v314_v25 }
  0x17   :  { %1719 = vmatpush3.bf16.msra.mxu1 %v1882_v3  ;;  %1698 = vmatprep.subr.bf16.mxu0 %v1883_v4  ;;  %v1890_v11 = vld [vmem:[#allocation2 + $0x90] sm:$0xff]   ;;  %v1891_v12 = vld [vmem:[#allocation2 + $0x58] sm:$0xff]   ;;  %v1895_v16 = vld [vmem:[#allocation2 + $0x60] sm:$0xff]  }
  0x18   :  { %1720 = vmatprep.subr.bf16.mxu1 %v1884_v5  ;;  %v1892_v13 = vld [vmem:[#allocation2 + $0xd8] sm:$0xff]   ;;  %v1896_v17 = vld [vmem:[#allocation2 + $0xe0] sm:$0xff]   ;;  %v1899_v20 = vld [vmem:[#allocation2 + $0x68] sm:$0xff]   ;;  %v2106_v37 = vsub.s32 %v315_v31, %v317_v32 }
  0x19   :  { %v1893_v14 = vld [vmem:[#allocation2 + $0x18] sm:$0xff]   ;;  %v1897_v18 = vld [vmem:[#allocation2 + $0x20] sm:$0xff]   ;;  %v1900_v21 = vld [vmem:[#allocation2 + $0xe8] sm:$0xff]  }
  0x1a   :  { %1699 = vmatpush3.bf16.msra.mxu0 %v1885_v6  ;;  %v1894_v15 = vld [vmem:[#allocation2 + $0x98] sm:$0xff]   ;;  %v1898_v19 = vld [vmem:[#allocation2 + $0xa0] sm:$0xff]   ;;  %v1901_v22 = vld [vmem:[#allocation2 + $0x28] sm:$0xff]  }
  0x1b   :  { %1721 = vmatpush3.bf16.msra.mxu1 %v1886_v7  ;;  %1700 = vmatprep.subr.bf16.mxu0 %v1887_v8  ;;  %v1902_v23 = vld [vmem:[#allocation2 + $0xa8] sm:$0xff]   ;;  %v1903_v27 = vld [vmem:[#allocation2 + $0x70] sm:$0xff]   ;;  %v1907_v33 = vld [vmem:[#allocation2 + $0x78] sm:$0xff]  }
  0x1c   :  { %1722 = vmatprep.subr.bf16.mxu1 %v1888_v9  ;;  %v1904_v28 = vld [vmem:[#allocation2 + $0xf0] sm:$0xff]   ;;  %v1908_v34 = vld [vmem:[#allocation2 + $0xf8] sm:$0xff]   ;;  %v1917_v43 = vld [vmem:[#allocation2 + $0x140] sm:$0xff]  }
  0x1d   :  { %v1905_v29 = vld [vmem:[#allocation2 + $0x30] sm:$0xff]   ;;  %v1909_v35 = vld [vmem:[#allocation2 + $0x38] sm:$0xff]   ;;  %v1918_v46 = vld [vmem:[#allocation2 + $0x1c0] sm:$0xff]  }
  0x1e   :  { %1701 = vmatpush3.bf16.msra.mxu0 %v1889_v10  ;;  %v1906_v30 = vld [vmem:[#allocation2 + $0xb0] sm:$0xff]   ;;  %v1910_v36 = vld [vmem:[#allocation2 + $0xb8] sm:$0xff]   ;;  %v1919_v51 = vld [vmem:[#allocation2 + $0x100] sm:$0xff]  }
  0x1f   :  { %1723 = vmatpush3.bf16.msra.mxu1 %v1890_v11  ;;  %1702 = vmatprep.subr.bf16.mxu0 %v1891_v12  ;;  %v1911_v38 = vld [vmem:[%s2171_s0] ss:$16 sps:$4 sm:$0xff]   ;;  %v1913_v39 = vld [vmem:[%s2171_s0 + $0x4] ss:$16 sps:$4 sm:$0xff]   ;;  %v1921_v56 = vld [vmem:[#allocation2 + $0x148] sm:$0xff]  }
  0x20   :  { %1724 = vmatprep.subr.bf16.mxu1 %v1892_v13  ;;  %v1914_v40 = vld [vmem:[%s2171_s0 + $0x20] ss:$16 sps:$4 sm:$0xff]   ;;  %v1916_v41 = vld [vmem:[%s2171_s0 + $0x24] ss:$16 sps:$4 sm:$0xff]   ;;  %v319_v42 = vrot.slane %v1911_v38, %v2106_v37  ;;  %v2122_v44 = vrot.slane %v1913_v39, %v2106_v37  ;;  %v1922_v59 = vld [vmem:[#allocation2 + $0x1c8] sm:$0xff]  }
  0x21   :  { %v333_v45 = vrot.slane %v1914_v40, %v2106_v37  ;;  %v2126_v47 = vrot.slane %v1916_v41, %v2106_v37  ;;  %v1920_v54 = vld [vmem:[#allocation2 + $0x180] sm:$0xff]   ;;  %v1923_v60 = vld [vmem:[#allocation2 + $0x108] sm:$0xff]   ;;  %v1925_v63 = vld [vmem:[#allocation2 + $0x150] sm:$0xff]  }
  0x22   :  { %1703 = vmatpush3.bf16.msra.mxu0 %v1893_v14  ;;  %v1924_v62 = vld [vmem:[#allocation2 + $0x188] sm:$0xff]   ;;  %v1926_v0 = vld [vmem:[#allocation2 + $0x1d0] sm:$0xff]   ;;  %v1929_v3 = vld [vmem:[#allocation2 + $0x158] sm:$0xff]  }
  0x23   :  { %1725 = vmatpush3.bf16.msra.mxu1 %v1894_v15  ;;  %1704 = vmatprep.subr.bf16.mxu0 %v1895_v16  ;;  %v342_v48 = vcombine.high %v319_v42, %v333_v45  ;;  %v341_v49 = vcombine.low %v319_v42, %v333_v45  ;;  %v344_v50 = vcombine.high %v2122_v44, %v2126_v47  ;;  %v1927_v1 = vld [vmem:[#allocation2 + $0x110] sm:$0xff]   ;;  %v1930_v4 = vld [vmem:[#allocation2 + $0x1d8] sm:$0xff]   ;;  %v1933_v7 = vld [vmem:[#allocation2 + $0x160] sm:$0xff]  }
  0x24   :  { %1726 = vmatprep.subr.bf16.mxu1 %v1896_v17  ;;  %v1928_v2 = vld [vmem:[#allocation2 + $0x190] sm:$0xff]   ;;  %v1931_v5 = vld [vmem:[#allocation2 + $0x118] sm:$0xff]   ;;  %v1934_v8 = vld [vmem:[#allocation2 + $0x1e0] sm:$0xff]  }
  0x25   :  { %v365_v52 = vrot.slane %v342_v48, %v2106_v37  ;;  %v351_v53 = vrot.slane %v341_v49, %v2106_v37  ;;  %v372_v55 = vrot.slane %v344_v50, %v2106_v37  ;;  %v1932_v6 = vld [vmem:[#allocation2 + $0x198] sm:$0xff]   ;;  %v1935_v9 = vld [vmem:[#allocation2 + $0x120] sm:$0xff]   ;;  %v1937_v11 = vld [vmem:[#allocation2 + $0x168] sm:$0xff]  }
  0x26   :  { %1705 = vmatpush3.bf16.msra.mxu0 %v1897_v18  ;;  %v1936_v10 = vld [vmem:[#allocation2 + $0x1a0] sm:$0xff]   ;;  %v1938_v12 = vld [vmem:[#allocation2 + $0x1e8] sm:$0xff]   ;;  %v1941_v15 = vld [vmem:[#allocation2 + $0x170] sm:$0xff]  }
  0x27   :  { %1727 = vmatpush3.bf16.msra.mxu1 %v1898_v19  ;;  %1706 = vmatprep.subr.bf16.mxu0 %v1899_v20  ;;  %v375_v57 = vcombine.high %v365_v52, %v365_v52  ;;  %v373_v58 = vcombine.high %v351_v53, %v351_v53  ;;  %v376_v61 = vcombine.high %v372_v55, %v372_v55  ;;  %v1939_v13 = vld [vmem:[#allocation2 + $0x128] sm:$0xff]   ;;  %v1942_v16 = vld [vmem:[#allocation2 + $0x1f0] sm:$0xff]   ;;  %v1945_v19 = vld [vmem:[#allocation2 + $0x178] sm:$0xff]  }
  0x28   :  { %1728 = vmatprep.subr.bf16.mxu1 %v1900_v21  ;;  %1261 = vmatprep.mubr.bf16.mxu0 %v365_v52  ;;  %v1940_v14 = vld [vmem:[#allocation2 + $0x1a8] sm:$0xff]   ;;  %v1943_v17 = vld [vmem:[#allocation2 + $0x130] sm:$0xff]   ;;  %v343_v20 = vcombine.low %v2122_v44, %v2126_v47  ;;  %v1946_v21 = vld [vmem:[#allocation2 + $0x1f8] sm:$0xff]  }
  0x29   :  { %1301 = vmatprep.mubr.bf16.mxu1 %v375_v57  ;;  %v1944_v18 = vld [vmem:[#allocation2 + $0x1b0] sm:$0xff]   ;;  %v1949_v25 = vld [vmem:[#allocation2 + $0x240] sm:$0xff]   ;;  %v1954_v31 = vld [vmem:[#allocation2 + $0x2c8] sm:$0xff]  }
  0x2a   :  { %1707 = vmatpush3.bf16.msra.mxu0 %v1901_v22  ;;  %v1947_v22 = vld [vmem:[#allocation2 + $0x138] sm:$0xff]   ;;  %v358_v24 = vrot.slane %v343_v20, %v2106_v37  ;;  %v1950_v26 = vld [vmem:[#allocation2 + $0x2c0] sm:$0xff]   ;;  %v1955_v32 = vld [vmem:[#allocation2 + $0x208] sm:$0xff]  }
  0x2b   :  { %1729 = vmatpush3.bf16.msra.mxu1 %v1902_v23  ;;  %1708 = vmatprep.subr.bf16.mxu0 %v1903_v27  ;;  %v1948_v23 = vld [vmem:[#allocation2 + $0x1b8] sm:$0xff]   ;;  %v1951_v27 = vld [vmem:[#allocation2 + $0x200] sm:$0xff]   ;;  %v1960_v38 = vld [vmem:[#allocation2 + $0x290] sm:$0xff]  }
  0x2c   :  { %1730 = vmatprep.subr.bf16.mxu1 %v1904_v28  ;;  %v1952_v28 = vld [vmem:[#allocation2 + $0x280] sm:$0xff]   ;;  %v1961_v39 = vld [vmem:[#allocation2 + $0x258] sm:$0xff]   ;;  %v1969_v47 = vld [vmem:[#allocation2 + $0x268] sm:$0xff]  }
  0x2d   :  { %v1962_v40 = vld [vmem:[#allocation2 + $0x2d8] sm:$0xff]   ;;  %v1966_v44 = vld [vmem:[#allocation2 + $0x2e0] sm:$0xff]   ;;  %v1970_v48 = vld [vmem:[#allocation2 + $0x2e8] sm:$0xff]  }
  0x2e   :  { %1709 = vmatpush3.bf16.msra.mxu0 %v1905_v29  ;;  %v374_v29 = vcombine.high %v358_v24, %v358_v24  ;;  %v1963_v41 = vld [vmem:[#allocation2 + $0x218] sm:$0xff]   ;;  %v1967_v45 = vld [vmem:[#allocation2 + $0x220] sm:$0xff]   ;;  %v1971_v49 = vld [vmem:[#allocation2 + $0x228] sm:$0xff]  }
  0x2f   :  { %1731 = vmatpush3.bf16.msra.mxu1 %v1906_v30  ;;  %1710 = vmatprep.subr.bf16.mxu0 %v1907_v33  ;;  %v1953_v30 = vld [vmem:[#allocation2 + $0x248] sm:$0xff]   ;;  %v1964_v42 = vld [vmem:[#allocation2 + $0x298] sm:$0xff]   ;;  %v1974_v52 = vld [vmem:[#allocation2 + $0x2f0] sm:$0xff]  }
  0x30   :  { %1732 = vmatprep.subr.bf16.mxu1 %v1908_v34  ;;  %v1956_v33 = vld [vmem:[#allocation2 + $0x288] sm:$0xff]   ;;  %v1957_v34 = vld [vmem:[#allocation2 + $0x250] sm:$0xff]   ;;  %v1979_v57 = vld [vmem:[#allocation2 + $0x238] sm:$0xff]  }
  0x31   :  { %v1972_v50 = vld [vmem:[#allocation2 + $0x2a8] sm:$0xff]   ;;  %v2001_v20 = vld [vmem:[#allocation2 + $0x360] sm:$0xff]  }
  0x32   :  { %1711 = vmatpush3.bf16.msra.mxu0 %v1909_v35  ;;  %v1958_v35 = vld [vmem:[#allocation2 + $0x2d0] sm:$0xff]  }
  0x33   :  { %1733 = vmatpush3.bf16.msra.mxu1 %v1910_v36  ;;  %1740 = vmatprep.subr.bf16.mxu0 %v1917_v43  ;;  %v1959_v36 = vld [vmem:[#allocation2 + $0x210] sm:$0xff]   ;;  %v1965_v43 = vld [vmem:[#allocation2 + $0x260] sm:$0xff]  }
  0x34   :  { %1762 = vmatprep.subr.bf16.mxu1 %v1918_v46  ;;  %v1968_v46 = vld [vmem:[#allocation2 + $0x2a0] sm:$0xff]  }
  0x35   :  { %1262 = vmatmul.mubr.bf16.vlgmr.msra.gmra.mrb[0].mxu0 %v351_v53  ;;  %v1975_v53 = vld [vmem:[#allocation2 + $0x230] sm:$0xff]  }
  0x36   :  { %1741 = vmatpush3.bf16.msra.mxu0 %v1919_v51  ;;  %1302 = vmatmul.mubr.bf16.vlgmr.msra.gmra.mrb[0].mxu1 %v373_v58  ;;  %v1973_v51 = vld [vmem:[#allocation2 + $0x270] sm:$0xff]   ;;  %v1981_v58 = vld [vmem:[%s2171_s0 + $0x8] ss:$16 sps:$4 sm:$0xff]  }
  0x37   :  { %1742 = vmatprep.subr.bf16.mxu0 %v1921_v56  ;;  %1763 = vmatpush3.bf16.msra.mxu1 %v1920_v54  ;;  %v1976_v54 = vld [vmem:[#allocation2 + $0x2b0] sm:$0xff]   ;;  %v1978_v56 = vld [vmem:[#allocation2 + $0x2f8] sm:$0xff]  }
  0x38   :  { %1341 = vmatprep.mubr.bf16.mxu0 %v372_v55  ;;  %1764 = vmatprep.subr.bf16.mxu1 %v1922_v59  ;;  %v1977_v55 = vld [vmem:[#allocation2 + $0x278] sm:$0xff]  }
  0x39   :  { %1381 = vmatprep.mubr.bf16.mxu1 %v376_v61  ;;  %v1983_v59 = vld [vmem:[%s2171_s0 + $0x28] ss:$16 sps:$4 sm:$0xff]  }
  0x3a   :  { %1743 = vmatpush3.bf16.msra.mxu0 %v1923_v60  ;;  %v1985_v60 = vld [vmem:[#allocation2 + $0x340] sm:$0xff]   ;;  %v1980_v61 = vld [vmem:[#allocation2 + $0x2b8] sm:$0xff]  }
  0x3b   :  { %1744 = vmatprep.subr.bf16.mxu0 %v1925_v63  ;;  %1765 = vmatpush3.bf16.msra.mxu1 %v1924_v62  ;;  %v387_v62 = vrot.slane %v1981_v58, %v2106_v37  ;;  %v401_v63 = vrot.slane %v1983_v59, %v2106_v37 }
  0x3c   :  { %1766 = vmatprep.subr.bf16.mxu1 %v1926_v0  ;;  %v1986_v0 = vld [vmem:[#allocation2 + $0x3c0] sm:$0xff]  }
  0x3e   :  { %1745 = vmatpush3.bf16.msra.mxu0 %v1927_v1  ;;  %v410_v1 = vcombine.high %v387_v62, %v401_v63 }
  0x3f   :  { %1746 = vmatprep.subr.bf16.mxu0 %v1929_v3  ;;  %1767 = vmatpush3.bf16.msra.mxu1 %v1928_v2  ;;  %v409_v2 = vcombine.low %v387_v62, %v401_v63 }
  0x40   :  { %1768 = vmatprep.subr.bf16.mxu1 %v1930_v4  ;;  %v433_v3 = vrot.slane %v410_v1, %v2106_v37 }
  0x41   :  { %v419_v4 = vrot.slane %v409_v2, %v2106_v37 }
  0x42   :  { %1747 = vmatpush3.bf16.msra.mxu0 %v1931_v5  ;;  %v1987_v5 = vld [vmem:[#allocation2 + $0x300] sm:$0xff]  }
  0x43   :  { %1748 = vmatprep.subr.bf16.mxu0 %v1933_v7  ;;  %1769 = vmatpush3.bf16.msra.mxu1 %v1932_v6  ;;  %v1989_v6 = vld [vmem:[#allocation2 + $0x348] sm:$0xff]   ;;  %v443_v7 = vcombine.high %v433_v3, %v433_v3 }
  0x44   :  { %1770 = vmatprep.subr.bf16.mxu1 %v1934_v8  ;;  %v441_v8 = vcombine.high %v419_v4, %v419_v4 }
  0x46   :  { %1749 = vmatpush3.bf16.msra.mxu0 %v1935_v9  ;;  %v1988_v9 = vld [vmem:[#allocation2 + $0x380] sm:$0xff]  }
  0x47   :  { %1750 = vmatprep.subr.bf16.mxu0 %v1937_v11  ;;  %1771 = vmatpush3.bf16.msra.mxu1 %v1936_v10  ;;  %v1990_v10 = vld [vmem:[#allocation2 + $0x3c8] sm:$0xff]  }
  0x48   :  { %1772 = vmatprep.subr.bf16.mxu1 %v1938_v12  ;;  %v1991_v11 = vld [vmem:[#allocation2 + $0x308] sm:$0xff]   ;;  %v1993_v12 = vld [vmem:[#allocation2 + $0x350] sm:$0xff]  }
  0x4a   :  { %1751 = vmatpush3.bf16.msra.mxu0 %v1939_v13  ;;  %v1992_v13 = vld [vmem:[#allocation2 + $0x388] sm:$0xff]  }
  0x4b   :  { %1752 = vmatprep.subr.bf16.mxu0 %v1941_v15  ;;  %1773 = vmatpush3.bf16.msra.mxu1 %v1940_v14  ;;  %v1994_v14 = vld [vmem:[#allocation2 + $0x3d0] sm:$0xff]  }
  0x4c   :  { %1774 = vmatprep.subr.bf16.mxu1 %v1942_v16  ;;  %v1995_v15 = vld [vmem:[#allocation2 + $0x310] sm:$0xff]   ;;  %v1997_v16 = vld [vmem:[#allocation2 + $0x358] sm:$0xff]  }
  0x4e   :  { %1753 = vmatpush3.bf16.msra.mxu0 %v1943_v17  ;;  %v1996_v17 = vld [vmem:[#allocation2 + $0x390] sm:$0xff]  }
  0x4f   :  { %1754 = vmatprep.subr.bf16.mxu0 %v1945_v19  ;;  %1775 = vmatpush3.bf16.msra.mxu1 %v1944_v18  ;;  %v1998_v18 = vld [vmem:[#allocation2 + $0x3d8] sm:$0xff]  }
  0x50   :  { %1776 = vmatprep.subr.bf16.mxu1 %v1946_v21  ;;  %v1999_v19 = vld [vmem:[#allocation2 + $0x318] sm:$0xff]  }
  0x51   :  { %v2000_v21 = vld [vmem:[#allocation2 + $0x398] sm:$0xff]  }
  0x52   :  { %1755 = vmatpush3.bf16.msra.mxu0 %v1947_v22  ;;  %v2002_v22 = vld [vmem:[#allocation2 + $0x3e0] sm:$0xff]  }
  0x53   :  { %1784 = vmatprep.subr.bf16.mxu0 %v1949_v25  ;;  %1777 = vmatpush3.bf16.msra.mxu1 %v1948_v23  ;;  %v2003_v23 = vld [vmem:[#allocation2 + $0x320] sm:$0xff]  }
  0x54   :  { %1806 = vmatprep.subr.bf16.mxu1 %v1950_v26  ;;  %v2004_v25 = vld [vmem:[#allocation2 + $0x3a0] sm:$0xff]   ;;  %v2006_v26 = vld [vmem:[#allocation2 + $0x3e8] sm:$0xff]  }
  0x55   :  { %1342 = vmatmul.mubr.bf16.vlgmr.msra.gmra.mrb[4].mxu0 %v358_v24  ;;  %v2005_v24 = vld [vmem:[#allocation2 + $0x368] sm:$0xff]  }
  0x56   :  { %1785 = vmatpush3.bf16.msra.mxu0 %v1951_v27  ;;  %1382 = vmatmul.mubr.bf16.vlgmr.msra.gmra.mrb[4].mxu1 %v374_v29  ;;  %v2007_v27 = vld [vmem:[#allocation2 + $0x328] sm:$0xff]  }
  0x57   :  { %1786 = vmatprep.subr.bf16.mxu0 %v1953_v30  ;;  %1807 = vmatpush3.bf16.msra.mxu1 %v1952_v28  ;;  %v2009_v28 = vld [vmem:[#allocation2 + $0x370] sm:$0xff]   ;;  %v2008_v29 = vld [vmem:[#allocation2 + $0x3a8] sm:$0xff]  }
  0x58   :  { %1808 = vmatprep.subr.bf16.mxu1 %v1954_v31  ;;  %1421 = vmatprep.mubr.bf16.mxu0 %v433_v3  ;;  %v2010_v30 = vld [vmem:[#allocation2 + $0x3f0] sm:$0xff]  }
  0x59   :  { %1461 = vmatprep.mubr.bf16.mxu1 %v443_v7  ;;  %v2011_v31 = vld [vmem:[#allocation2 + $0x330] sm:$0xff]  }
  0x5a   :  { %1787 = vmatpush3.bf16.msra.mxu0 %v1955_v32  ;;  %v2013_v32 = vld [vmem:[#allocation2 + $0x378] sm:$0xff]  }
  0x5b   :  { %1788 = vmatprep.subr.bf16.mxu0 %v1957_v34  ;;  %1809 = vmatpush3.bf16.msra.mxu1 %v1956_v33  ;;  %v2012_v33 = vld [vmem:[#allocation2 + $0x3b0] sm:$0xff]   ;;  %v2017_v34 = vld [vmem:[%s2171_s0 + $0xc] ss:$16 sps:$4 sm:$0xff]  }
  0x5c   :  { %1810 = vmatprep.subr.bf16.mxu1 %v1958_v35  ;;  %v2014_v35 = vld [vmem:[#allocation2 + $0x3f8] sm:$0xff]  }
  0x5e   :  { %1789 = vmatpush3.bf16.msra.mxu0 %v1959_v36  ;;  %v2018_v36 = vld [vmem:[%s2171_s0 + $0x2c] ss:$16 sps:$4 sm:$0xff]  }
  0x5f   :  { %1790 = vmatprep.subr.bf16.mxu0 %v1961_v39  ;;  %1811 = vmatpush3.bf16.msra.mxu1 %v1960_v38  ;;  %v2015_v38 = vld [vmem:[#allocation2 + $0x338] sm:$0xff]   ;;  %v394_v39 = vrot.slane %v2017_v34, %v2106_v37 }
  0x60   :  { %1812 = vmatprep.subr.bf16.mxu1 %v1962_v40  ;;  %v408_v40 = vrot.slane %v2018_v36, %v2106_v37 }
  0x62   :  { %1791 = vmatpush3.bf16.msra.mxu0 %v1963_v41  ;;  %v2016_v41 = vld [vmem:[#allocation2 + $0x3b8] sm:$0xff]  }
  0x63   :  { %1792 = vmatprep.subr.bf16.mxu0 %v1965_v43  ;;  %1813 = vmatpush3.bf16.msra.mxu1 %v1964_v42  ;;  %v412_v42 = vcombine.high %v394_v39, %v408_v40  ;;  %v411_v43 = vcombine.low %v394_v39, %v408_v40 }
  0x64   :  { %1814 = vmatprep.subr.bf16.mxu1 %v1966_v44 }
  0x65   :  { %v440_v44 = vrot.slane %v412_v42, %v2106_v37 }
  0x66   :  { %1793 = vmatpush3.bf16.msra.mxu0 %v1967_v45  ;;  %v426_v45 = vrot.slane %v411_v43, %v2106_v37 }
  0x67   :  { %1794 = vmatprep.subr.bf16.mxu0 %v1969_v47  ;;  %1815 = vmatpush3.bf16.msra.mxu1 %v1968_v46  ;;  %v444_v46 = vcombine.high %v440_v44, %v440_v44 }
  0x68   :  { %1816 = vmatprep.subr.bf16.mxu1 %v1970_v48  ;;  %v442_v47 = vcombine.high %v426_v45, %v426_v45 }
  0x6a   :  { %1795 = vmatpush3.bf16.msra.mxu0 %v1971_v49  ;;  %v1567_v49 = vld [vmem:[%s2173_s2] ss:$0 sm:$0xff] }
  0x6b   :  { %1796 = vmatprep.subr.bf16.mxu0 %v1973_v51  ;;  %1817 = vmatpush3.bf16.msra.mxu1 %v1972_v50 }
  0x6c   :  { %1818 = vmatprep.subr.bf16.mxu1 %v1974_v52 }
  0x6e   :  { %1797 = vmatpush3.bf16.msra.mxu0 %v1975_v53 }
  0x6f   :  { %1798 = vmatprep.subr.bf16.mxu0 %v1977_v55  ;;  %1819 = vmatpush3.bf16.msra.mxu1 %v1976_v54 }
  0x70   :  { %1820 = vmatprep.subr.bf16.mxu1 %v1978_v56 }
  0x72   :  { %1799 = vmatpush3.bf16.msra.mxu0 %v1979_v57 }
  0x73   :  { %1828 = vmatprep.subr.bf16.mxu0 %v1985_v60  ;;  %1821 = vmatpush3.bf16.msra.mxu1 %v1980_v61 }
  0x74   :  { %1850 = vmatprep.subr.bf16.mxu1 %v1986_v0 }
  0x75   :  { %1422 = vmatmul.mubr.bf16.vlgmr.msra.gmra.mrb[8].mxu0 %v419_v4 }
  0x76   :  { %1829 = vmatpush3.bf16.msra.mxu0 %v1987_v5  ;;  %1462 = vmatmul.mubr.bf16.vlgmr.msra.gmra.mrb[8].mxu1 %v441_v8 }
  0x77   :  { %1830 = vmatprep.subr.bf16.mxu0 %v1989_v6  ;;  %1851 = vmatpush3.bf16.msra.mxu1 %v1988_v9 }
  0x78   :  { %1852 = vmatprep.subr.bf16.mxu1 %v1990_v10  ;;  %1501 = vmatprep.mubr.bf16.mxu0 %v440_v44 }
  0x79   :  { %1541 = vmatprep.mubr.bf16.mxu1 %v444_v46 }
  0x7a   :  { %1831 = vmatpush3.bf16.msra.mxu0 %v1991_v11 }
  0x7b   :  { %1832 = vmatprep.subr.bf16.mxu0 %v1993_v12  ;;  %1853 = vmatpush3.bf16.msra.mxu1 %v1992_v13 }
  0x7c   :  { %1854 = vmatprep.subr.bf16.mxu1 %v1994_v14 }
  0x7e   :  { %1833 = vmatpush3.bf16.msra.mxu0 %v1995_v15 }
  0x7f   :  { %1834 = vmatprep.subr.bf16.mxu0 %v1997_v16  ;;  %1855 = vmatpush3.bf16.msra.mxu1 %v1996_v17 }
  0x80   :  { %1856 = vmatprep.subr.bf16.mxu1 %v1998_v18 }
  0x82   :  { %1835 = vmatpush3.bf16.msra.mxu0 %v1999_v19 }
  0x83   :  { %1836 = vmatprep.subr.bf16.mxu0 %v2001_v20  ;;  %1857 = vmatpush3.bf16.msra.mxu1 %v2000_v21 }
  0x84   :  { %1858 = vmatprep.subr.bf16.mxu1 %v2002_v22 }
  0x86   :  { %1837 = vmatpush3.bf16.msra.mxu0 %v2003_v23 }
  0x87   :  { %1838 = vmatprep.subr.bf16.mxu0 %v2005_v24  ;;  %1859 = vmatpush3.bf16.msra.mxu1 %v2004_v25 }
  0x88   :  { %1860 = vmatprep.subr.bf16.mxu1 %v2006_v26 }
  0x8a   :  { %1839 = vmatpush3.bf16.msra.mxu0 %v2007_v27 }
  0x8b   :  { %1840 = vmatprep.subr.bf16.mxu0 %v2009_v28  ;;  %1861 = vmatpush3.bf16.msra.mxu1 %v2008_v29 }
  0x8c   :  { %1862 = vmatprep.subr.bf16.mxu1 %v2010_v30 }
  0x8e   :  { %1841 = vmatpush3.bf16.msra.mxu0 %v2011_v31 }
  0x8f   :  { %1842 = vmatprep.subr.bf16.mxu0 %v2013_v32  ;;  %1863 = vmatpush3.bf16.msra.mxu1 %v2012_v33 }
  0x90   :  { %1864 = vmatprep.subr.bf16.mxu1 %v2014_v35 }
  0x92   :  { %1843 = vmatpush3.bf16.msra.mxu0 %v2015_v38 }
  0x93   :  { %1865 = vmatpush3.bf16.msra.mxu1 %v2016_v41 }
  0x95   :  { %1502 = vmatmul.mubr.bf16.vlgmr.msra.gmra.mrb[12].mxu0 %v426_v45 }
  0x96   :  { %1542 = vmatmul.mubr.bf16.vlgmr.msra.gmra.mrb[12].mxu1 %v442_v47 }
 0x108   :  { %v1712_v48 = vpop.f32.mrb[0].mxu0 }
 0x109   :  { %v1713_v50 = vpop.f32.mrb[1].mxu0  ;;  %v1734_v51 = vpop.f32.mrb[0].mxu1 }
 0x10a   :  { %v1714_v52 = vadd.f32 %v1713_v50, %v1712_v48  ;;  %v1715_v53 = vpop.f32.mrb[2].mxu0  ;;  %v1735_v54 = vpop.f32.mrb[1].mxu1 }
 0x10b   :  { %v1716_v55 = vpop.f32.mrb[3].mxu0  ;;  %v1736_v37 = vadd.f32 %v1735_v54, %v1734_v51  ;;  %v1737_v57 = vpop.f32.mrb[2].mxu1 }
 0x10c   :  { %v1264_v56 = vadd.f32 %v1714_v52, %v1567_v49  ;;  %v1738_v58 = vpop.f32.mrb[3].mxu1 }
 0x10e   :  { %v1304_v59 = vadd.f32 %v1736_v37, %v1264_v56 }
 0x128   :  { %v1756_v60 = vpop.f32.mrb[4].mxu0 }
 0x129   :  { %v1757_v61 = vpop.f32.mrb[5].mxu0  ;;  %v1778_v62 = vpop.f32.mrb[4].mxu1 }
 0x12a   :  { %v1758_v63 = vadd.f32 %v1757_v61, %v1756_v60  ;;  %v1759_v0 = vpop.f32.mrb[6].mxu0  ;;  %v1779_v1 = vpop.f32.mrb[5].mxu1 }
 0x12b   :  { %v1760_v2 = vpop.f32.mrb[7].mxu0  ;;  %v1780_v4 = vadd.f32 %v1779_v1, %v1778_v62  ;;  %v1781_v5 = vpop.f32.mrb[6].mxu1 }
 0x12c   :  { %v1344_v3 = vadd.f32 %v1758_v63, %v1304_v59  ;;  %v1782_v6 = vpop.f32.mrb[7].mxu1 }
 0x12e   :  { %v1384_v7 = vadd.f32 %v1780_v4, %v1344_v3 }
 0x148   :  { %v1800_v8 = vpop.f32.mrb[8].mxu0 }
 0x149   :  { %v1801_v9 = vpop.f32.mrb[9].mxu0  ;;  %v1822_v10 = vpop.f32.mrb[8].mxu1 }
 0x14a   :  { %v1802_v11 = vadd.f32 %v1801_v9, %v1800_v8  ;;  %v1803_v12 = vpop.f32.mrb[10].mxu0  ;;  %v1823_v13 = vpop.f32.mrb[9].mxu1 }
 0x14b   :  { %v1804_v14 = vpop.f32.mrb[11].mxu0  ;;  %v1824_v16 = vadd.f32 %v1823_v13, %v1822_v10  ;;  %v1825_v17 = vpop.f32.mrb[10].mxu1 }
 0x14c   :  { %v1424_v15 = vadd.f32 %v1802_v11, %v1384_v7  ;;  %v1826_v18 = vpop.f32.mrb[11].mxu1 }
 0x14e   :  { %v1464_v19 = vadd.f32 %v1824_v16, %v1424_v15 }
 0x168   :  { %v1844_v20 = vpop.f32.mrb[12].mxu0 }
 0x169   :  { %v1845_v21 = vpop.f32.mrb[13].mxu0  ;;  %v1866_v22 = vpop.f32.mrb[12].mxu1 }
 0x16a   :  { %v1846_v23 = vadd.f32 %v1845_v21, %v1844_v20  ;;  %v1847_v24 = vpop.f32.mrb[14].mxu0  ;;  %v1867_v25 = vpop.f32.mrb[13].mxu1 }
 0x16b   :  { %v1848_v26 = vpop.f32.mrb[15].mxu0  ;;  %v1868_v28 = vadd.f32 %v1867_v25, %v1866_v22  ;;  %v1869_v29 = vpop.f32.mrb[14].mxu1 }
 0x16c   :  { %v1504_v27 = vadd.f32 %v1846_v23, %v1464_v19  ;;  %v1870_v30 = vpop.f32.mrb[15].mxu1 }
 0x16e   :  { %v1544_v31 = vadd.f32 %v1868_v28, %v1504_v27 }
 0x170   :  { %1549 = vst [vmem:[#allocation5] sm:$0xff] %v1544_v31 }
 0x171   :  { %1554 = vsyncadd [#allocation4], 96  ;;  %s2071_s2 = smov [#allocation5]  }
 0x172   :  { %s1555_s15 = sshll.u32 %s2071_s2, 4  ;;  %s1556_s15 = int_to_ptr.vmem [resolvable:$true] %s1555_s15 }
 0x173   :  { %s2041_s16 = scalar_lea.vmem %s1556_s15, 32  ;;  %s2045_s17 = scalar_lea.vmem %s1556_s15, 128 }
 0x174   :  { %p2042_p8 = scmp.ne.s32.totalorder %s1556_s15, %s2041_s16  ;;  %p2046_p9 = scmp.lt.s32.totalorder %s1556_s15, %s1556_s15 }
 0x175   :  { %p2047_p10 = scmp.lt.s32.totalorder %s2045_s17, %s2041_s16 }
 0x177   :  { %p2048_p11 = por %p2047_p10, %p2046_p9 }
 0x179   :  { %p2049_p12 = pnand %p2048_p11, %p2042_p8 }
 0x17b   :  { %2052 = shalt.err (!%p2049_p12)
}
 0x17c   :  { %s2053_s20 = scalar_lea.hbm %s2174_s3, 32 }
 0x17d   :  { %p2054_p13 = scmp.ne.s32.totalorder %s2174_s3, %s2053_s20  ;;  %p2057_p0 = scmp.lt.u32.totalorder %s2053_s20, %s2174_s3 }
 0x17f   :  { %p2059_p1 = pnand %p2057_p0, %p2054_p13 }
 0x181   :  { %2062 = shalt.err (!%p2059_p1)
}
 0x182   :  { %s2072_s25 = smov 32   ;;  %s2073_s1 = smov 2  }
 0x183   :  { %1561 = dma.vmem_to_hbm [thread:$0]  %s1556_s15, 32, %s2174_s3, [#allocation4], %s2072_s25, %s2072_s25, %s2073_s1  }
 0x184   :  { %2065 = dma.done.wait [#allocation4], 128  }
 0x185   :  { %2066 = vsyncadd [#allocation4], 4294967168 }
 0x186   :  { %1565 = vsyncpa [#allocation3], 1 }
 0x187   :  { %1566 = vsyncpa [#allocation4], 1 }

</bundles_post_ra>
